<compile_context>
chip_gen: v5e
topology: v5e:2x2
jax: 0.10.0
libtpu: 0.0.40
codegen_flags: <defaults>
</compile_context>

<pallas_src>
import inspect
import math

import jax
import jax.numpy as jnp
from jax.experimental import pallas as pl
from jax.experimental.pallas import tpu as pltpu


# ---------------------------------------------------------------------------
# Kernel body
# ---------------------------------------------------------------------------
def _gwl_kernel(w_ref, b_ref, x_ref, o_ref):
    # w_ref: (1, C, D), b_ref: (1, C), x_ref: (TB, C, D), o_ref: (TB, C)
    w = w_ref[...].astype(jnp.float32)          # broadcast over TB
    x = x_ref[...].astype(jnp.float32)
    red = jnp.sum(w * x, axis=-1)               # (TB, C) lane-axis reduction
    o_ref[...] = (red + b_ref[...].astype(jnp.float32)).astype(o_ref.dtype)


# ---------------------------------------------------------------------------
# Tiling heuristics
# ---------------------------------------------------------------------------
def _vmem_capacity_bytes():
    """Per-core VMEM capacity; conservative (v7x) fallback if query fails."""
    try:
        info = pltpu.get_tpu_info()
        cap = getattr(info, "vmem_capacity_bytes", None)
        if cap:
            return int(cap)
    except Exception:
        pass
    return 64 * 1024 * 1024


def _choose_batch_tile(B, C, D, x_dtype, w_dtype, out_dtype):
    """Pick how many batch rows (TB) to process per grid step."""
    x_bytes = jnp.dtype(x_dtype).itemsize
    w_bytes = jnp.dtype(w_dtype).itemsize
    o_bytes = jnp.dtype(out_dtype).itemsize

    cap = _vmem_capacity_bytes()
    budget = int(cap * 0.6)                              # headroom for compiler scratch
    vmem_limit = min(int(cap * 0.75), 100 * 1024 * 1024)

    # Per batch-row VMEM cost inside the pipeline:
    #   double-buffered x tile + worst-case f32 product + double-buffered out tile.
    per_row = 2 * C * D * x_bytes + C * D * 4 + 2 * C * o_bytes
    # Constant W / bias blocks (assume double-buffered as the worst case).
    fixed = 2 * C * (D + 1) * w_bytes

    tb = max(1, (budget - fixed) // per_row)
    tb = int(min(tb, B))

    # Keep the grid several steps long so the "parallel" batch axis can shard
    # across TensorCores (v7x megacore), as long as tiles stay >= ~1 MiB.
    steps_tb = B // 8
    if steps_tb >= 1 and steps_tb * C * D * x_bytes >= (1 << 20):
        tb = min(tb, max(8, (steps_tb // 8) * 8))

    # Sublane-align the (TB, C) output block when it is a true sub-tile.
    if tb < B and tb >= 8:
        tb = (tb // 8) * 8
    return max(1, int(tb)), int(vmem_limit)


# Does this JAX expose pipeline_mode / pl.Buffered for single-buffering W/bias?
try:
    _SUPPORTS_PIPELINE_MODE = (
        hasattr(pl, "Buffered")
        and "pipeline_mode" in inspect.signature(pl.BlockSpec).parameters
    )
except (TypeError, ValueError):
    _SUPPORTS_PIPELINE_MODE = False


def _build_specs(C, D, tb, single_buffer_weights):
    const_kwargs = {}
    if single_buffer_weights and _SUPPORTS_PIPELINE_MODE:
        # Constant-index blocks: one resident copy is enough; frees VMEM for x.
        const_kwargs = dict(pipeline_mode=pl.Buffered(1))
    in_specs = [
        pl.BlockSpec((1, C, D), lambda i: (0, 0, 0), **const_kwargs),  # W (shared)
        pl.BlockSpec((1, C), lambda i: (0, 0), **const_kwargs),        # bias (shared)
        pl.BlockSpec((tb, C, D), lambda i: (i, 0, 0)),                 # x batch tile
    ]
    out_specs = pl.BlockSpec((tb, C), lambda i: (i, 0))
    return in_specs, out_specs


# ---------------------------------------------------------------------------
# Public wrapper
# ---------------------------------------------------------------------------
def group_wise_linear(x, W, b, *, batch_tile=None, out_dtype=None):
    """x: (B, C, D), W: (1, C, D), b: (1, C) -> (B, C)."""
    B, C, D = x.shape
    assert W.shape == (1, C, D)
    assert b.shape == (1, C)
    out_dtype = out_dtype if out_dtype is not None else x.dtype

    tb, vmem_limit = _choose_batch_tile(B, C, D, x.dtype, W.dtype, out_dtype)
    if batch_tile is not None:
        tb = int(min(batch_tile, B))
    grid = (pl.cdiv(B, tb),)

    def _call(single_buffer_weights):
        in_specs, out_specs = _build_specs(C, D, tb, single_buffer_weights)
        return pl.pallas_call(
            _gwl_kernel,
            out_shape=jax.ShapeDtypeStruct((B, C), out_dtype),
            grid_spec=pltpu.PrefetchScalarGridSpec(
                num_scalar_prefetch=0,
                grid=grid,
                in_specs=in_specs,
                out_specs=out_specs,
            ),
            compiler_params=pltpu.CompilerParams(
                dimension_semantics=("parallel",),
                vmem_limit_bytes=vmem_limit,
            ),
        )(W, b, x)

    try:
        return _call(single_buffer_weights=True)
    except Exception:
        # Fallback if this JAX build rejects pl.Buffered(1) on a pallas_call
        # BlockSpec: use the default double-buffered constant blocks.
        return _call(single_buffer_weights=False)


def init_params(key, num_class, hidden_dim, dtype=jnp.float32):
    # Matches PyTorch reset_parameters: uniform(-stdv, stdv), stdv = 1/sqrt(hidden_dim)
    stdv = 1.0 / math.sqrt(hidden_dim)
    kw, kb = jax.random.split(key)
    W = jax.random.uniform(kw, (1, num_class, hidden_dim), dtype=dtype,
                           minval=-stdv, maxval=stdv)
    b = jax.random.uniform(kb, (1, num_class), dtype=dtype,
                           minval=-stdv, maxval=stdv)
    return W, b


if __name__ == "__main__":
    key = jax.random.PRNGKey(0)
    kx1, kx2, kx3, kp = jax.random.split(key, 4)

    # --- Test 1: original small f32 case (single grid step, TB == B) --------
    B, C, D = 2, 8, 32
    x = jax.random.normal(kx1, (B, C, D), dtype=jnp.float32)
    W, b = init_params(kp, C, D)
    out = jax.block_until_ready(group_wise_linear(x, W, b))
    ref = jnp.sum(W * x, axis=-1) + b
    assert out.shape == (B, C)
    assert jnp.allclose(out, ref, atol=1e-5, rtol=1e-5)

    # --- Test 2: multi-step grid with a partial last batch tile -------------
    B2, C2, D2 = 20, 8, 128
    x2 = jax.random.normal(kx2, (B2, C2, D2), dtype=jnp.float32)
    W2, b2 = init_params(kp, C2, D2)
    out2 = jax.block_until_ready(group_wise_linear(x2, W2, b2, batch_tile=8))
    ref2 = jnp.sum(W2 * x2, axis=-1) + b2
    assert out2.shape == (B2, C2)
    assert jnp.allclose(out2, ref2, atol=1e-5, rtol=1e-5)

    # --- Test 3: bf16 inputs (halved HBM traffic), f32 accumulation ---------
    B3, C3, D3 = 4, 8, 128
    x3 = jax.random.normal(kx3, (B3, C3, D3), dtype=jnp.float32)
    W3, b3 = init_params(kp, C3, D3)
    out3 = jax.block_until_ready(
        group_wise_linear(x3.astype(jnp.bfloat16),
                          W3.astype(jnp.bfloat16),
                          b3.astype(jnp.bfloat16)))
    ref3 = (jnp.sum(W3.astype(jnp.bfloat16).astype(jnp.float32)
                    * x3.astype(jnp.bfloat16).astype(jnp.float32), axis=-1)
            + b3.astype(jnp.bfloat16).astype(jnp.float32))
    assert out3.shape == (B3, C3)
    assert jnp.allclose(out3.astype(jnp.float32), ref3, atol=5e-2, rtol=5e-2)

    print("KERNEL_OK")
</pallas_src>

<mosaic_0001>
module attributes {stable_mosaic.version = 11 : i64} {
  func.func @_gwl_kernel(%arg0: i32, %arg1: memref<1x8x32xf32, #tpu.memory_space<vmem>>, %arg2: memref<1x8xf32, #tpu.memory_space<vmem>>, %arg3: memref<2x8x32xf32, #tpu.memory_space<vmem>>, %arg4: memref<2x8xf32, #tpu.memory_space<vmem>>) attributes {dimension_semantics = [#tpu.dimension_semantics<parallel>], iteration_bounds = array<i64: 1>, scalar_prefetch = 0 : i64, scratch_operands = 0 : i64, tpu.core_type = #tpu.core_type<tc>, window_params = [{pipeline_mode = #tpu.pipeline_mode<synchronous>, transform_indices = @transform_0, window_bounds = array<i64: 1, 8, 32>}, {pipeline_mode = #tpu.pipeline_mode<synchronous>, transform_indices = @transform_1, window_bounds = array<i64: 1, 8>}, {transform_indices = @transform_2, window_bounds = array<i64: 2, 8, 32>}, {transform_indices = @transform_3, window_bounds = array<i64: 2, 8>}]} {
    %c0 = arith.constant 0 : index
    %c0_0 = arith.constant 0 : index
    %c0_1 = arith.constant 0 : index
    %0 = vector.load %arg1[%c0, %c0_0, %c0_1] : memref<1x8x32xf32, #tpu.memory_space<vmem>>, vector<1x8x32xf32>
    %c0_2 = arith.constant 0 : index
    %c0_3 = arith.constant 0 : index
    %c0_4 = arith.constant 0 : index
    %1 = vector.load %arg3[%c0_2, %c0_3, %c0_4] : memref<2x8x32xf32, #tpu.memory_space<vmem>>, vector<2x8x32xf32>
    %2 = vector.broadcast %0 : vector<1x8x32xf32> to vector<2x8x32xf32>
    %3 = arith.mulf %2, %1 : vector<2x8x32xf32>
    %cst = arith.constant dense<0.000000e+00> : vector<2x8xf32>
    %4 = vector.multi_reduction <add>, %3, %cst [2] : vector<2x8x32xf32> to vector<2x8xf32>
    %c0_5 = arith.constant 0 : index
    %c0_6 = arith.constant 0 : index
    %5 = vector.load %arg2[%c0_5, %c0_6] : memref<1x8xf32, #tpu.memory_space<vmem>>, vector<1x8xf32>
    %6 = vector.broadcast %5 : vector<1x8xf32> to vector<2x8xf32>
    %7 = arith.addf %4, %6 : vector<2x8xf32>
    %c0_7 = arith.constant 0 : index
    %c0_8 = arith.constant 0 : index
    %8 = vector.load %arg4[%c0_7, %c0_8] : memref<2x8xf32, #tpu.memory_space<vmem>>, vector<2x8xf32>
    tpu.vector_store %arg4[%c0_7, %c0_8], %7 {strides = array<i32>} : memref<2x8xf32, #tpu.memory_space<vmem>>, vector<2x8xf32>,
    return
  }
  func.func @transform_0(%arg0: i32) -> (i32, i32, i32) {
    %c0_i32 = arith.constant 0 : i32
    %c0_i32_0 = arith.constant 0 : i32
    %c0_i32_1 = arith.constant 0 : i32
    %c0_i32_2 = arith.constant 0 : i32
    return %c0_i32, %c0_i32_0, %c0_i32_1 : i32, i32, i32
  }
  func.func @transform_1(%arg0: i32) -> (i32, i32) {
    %c0_i32 = arith.constant 0 : i32
    %c0_i32_0 = arith.constant 0 : i32
    %c0_i32_1 = arith.constant 0 : i32
    return %c0_i32, %c0_i32_0 : i32, i32
  }
  func.func @transform_2(%arg0: i32) -> (i32, i32, i32) {
    %c0_i32 = arith.constant 0 : i32
    %c0_i32_0 = arith.constant 0 : i32
    %c0_i32_1 = arith.constant 0 : i32
    return %arg0, %c0_i32, %c0_i32_0 : i32, i32, i32
  }
  func.func @transform_3(%arg0: i32) -> (i32, i32) {
    %c0_i32 = arith.constant 0 : i32
    %c0_i32_0 = arith.constant 0 : i32
    return %arg0, %c0_i32 : i32, i32
  }
}

module attributes {stable_mosaic.version = 11 : i64} {
  func.func @_gwl_kernel(%arg0: i32, %arg1: memref<1x8x32xf32, #tpu.memory_space<vmem>>, %arg2: memref<1x8xf32, #tpu.memory_space<vmem>>, %arg3: memref<2x8x32xf32, #tpu.memory_space<vmem>>, %arg4: memref<2x8xf32, #tpu.memory_space<vmem>>) attributes {dimension_semantics = [#tpu.dimension_semantics<parallel>], iteration_bounds = array<i64: 1>, scalar_prefetch = 0 : i64, scratch_operands = 0 : i64, tpu.core_type = #tpu.core_type<tc>, window_params = [{pipeline_mode = #tpu.pipeline_mode<synchronous>, transform_indices = @transform_0, window_bounds = array<i64: 1, 8, 32>}, {pipeline_mode = #tpu.pipeline_mode<synchronous>, transform_indices = @transform_1, window_bounds = array<i64: 1, 8>}, {transform_indices = @transform_2, window_bounds = array<i64: 2, 8, 32>}, {transform_indices = @transform_3, window_bounds = array<i64: 2, 8>}]} {
    %c0 = arith.constant 0 : index
    %c0_0 = arith.constant 0 : index
    %c0_1 = arith.constant 0 : index
    %0 = vector.load %arg1[%c0, %c0_0, %c0_1] : memref<1x8x32xf32, #tpu.memory_space<vmem>>, vector<1x8x32xf32>
    %c0_2 = arith.constant 0 : index
    %c0_3 = arith.constant 0 : index
    %c0_4 = arith.constant 0 : index
    %1 = vector.load %arg3[%c0_2, %c0_3, %c0_4] : memref<2x8x32xf32, #tpu.memory_space<vmem>>, vector<2x8x32xf32>
    %2 = vector.broadcast %0 : vector<1x8x32xf32> to vector<2x8x32xf32>
    %3 = arith.mulf %2, %1 : vector<2x8x32xf32>
    %cst = arith.constant dense<0.000000e+00> : vector<2x8xf32>
    %4 = vector.multi_reduction <add>, %3, %cst [2] : vector<2x8x32xf32> to vector<2x8xf32>
    %c0_5 = arith.constant 0 : index
    %c0_6 = arith.constant 0 : index
    %5 = vector.load %arg2[%c0_5, %c0_6] : memref<1x8xf32, #tpu.memory_space<vmem>>, vector<1x8xf32>
    %6 = vector.broadcast %5 : vector<1x8xf32> to vector<2x8xf32>
    %7 = arith.addf %4, %6 : vector<2x8xf32>
    %c0_7 = arith.constant 0 : index
    %c0_8 = arith.constant 0 : index
    %8 = vector.load %arg4[%c0_7, %c0_8] : memref<2x8xf32, #tpu.memory_space<vmem>>, vector<2x8xf32>
    tpu.vector_store %arg4[%c0_7, %c0_8], %7 {strides = array<i32>} : memref<2x8xf32, #tpu.memory_space<vmem>>, vector<2x8xf32>,
    return
  }
  func.func @transform_0(%arg0: i32) -> (i32, i32, i32) {
    %c0_i32 = arith.constant 0 : i32
    %c0_i32_0 = arith.constant 0 : i32
    %c0_i32_1 = arith.constant 0 : i32
    %c0_i32_2 = arith.constant 0 : i32
    return %c0_i32, %c0_i32_0, %c0_i32_1 : i32, i32, i32
  }
  func.func @transform_1(%arg0: i32) -> (i32, i32) {
    %c0_i32 = arith.constant 0 : i32
    %c0_i32_0 = arith.constant 0 : i32
    %c0_i32_1 = arith.constant 0 : i32
    return %c0_i32, %c0_i32_0 : i32, i32
  }
  func.func @transform_2(%arg0: i32) -> (i32, i32, i32) {
    %c0_i32 = arith.constant 0 : i32
    %c0_i32_0 = arith.constant 0 : i32
    %c0_i32_1 = arith.constant 0 : i32
    return %arg0, %c0_i32, %c0_i32_0 : i32, i32, i32
  }
  func.func @transform_3(%arg0: i32) -> (i32, i32) {
    %c0_i32 = arith.constant 0 : i32
    %c0_i32_0 = arith.constant 0 : i32
    return %arg0, %c0_i32 : i32, i32
  }
}

</mosaic_0001>

<bundles_post_ra>
// kernel: tpu_custom_call.1
= control target key start
LH: loop header
LB: loop body
LE: loop exit
PB: predicated region body
PF: predicated region fallthrough
CT: control target
= control target key end

     0   :  { %8 = vsyncpa [#allocation3], 0  ;;  %s270_s0 = inlined_call_operand.hbm [shape: f32[1,8,32], index: 0, kind: input, shape index: {}]   ;;  %s271_s1 = inlined_call_operand.hbm [shape: f32[1,8], index: 1, kind: input, shape index: {}]   ;;  %s272_s2 = inlined_call_operand.hbm [shape: f32[2,8,32], index: 2, kind: input, shape index: {}]   ;;  %s273_s3 = inlined_call_operand.hbm [shape: f32[2,8], index: 3, kind: output, shape index: {}]  }
   0x1   :  { %9 = vsyncpa [#allocation6], 0  ;;  %s27_s14 = sshll.u32 %s271_s1, 4  ;;  %s28_s14 = int_to_ptr.hbm [resolvable:$true] %s27_s14 }
   0x2   :  { %10 = vsyncpa [#allocation4], 0  ;;  %s231_s15 = smov [#allocation5]   ;;  %s16_s19 = sshll.u32 %s270_s0, 4  ;;  %s17_s19 = int_to_ptr.hbm [resolvable:$true] %s16_s19 }
   0x3   :  { %s29_s16 = sshll.u32 %s231_s15, 4  ;;  %s232_s20 = smov [#allocation2]   ;;  %s30_s16 = int_to_ptr.vmem [resolvable:$true] %s29_s16 }
   0x4   :  { %32 = dma.hbm_to_vmem [thread:$0]  %s28_s14, 16, %s30_s16, [#allocation6]  }
   0x5   :  { %s18_s21 = sshll.u32 %s232_s20, 4  ;;  %s37_s24 = sshll.u32 %s272_s2, 4  ;;  %s19_s21 = int_to_ptr.vmem [resolvable:$true] %s18_s21  ;;  %s38_s24 = int_to_ptr.hbm [resolvable:$true] %s37_s24 }
   0x6   :  { %21 = dma.hbm_to_vmem [thread:$0]  %s17_s19, 128, %s19_s21, [#allocation3]  }
   0x7   :  { %s233_s1 = smov [#allocation7]   ;;  %s234_s26 = smov 128  }
   0x8   :  { %s39_s25 = sshll.u32 %s233_s1, 4  ;;  %s235_s27 = smov 8   ;;  %s40_s25 = int_to_ptr.vmem [resolvable:$true] %s39_s25 }
   0x9   :  { %45 = dma.hbm_to_vmem [thread:$0]  %s38_s24, 256, %s40_s25, [#allocation6], %s234_s26, %s234_s26, %s235_s27  }
   0xa   :  { %225 = dma.done.wait [#allocation3], 128  }
   0xb   :  { %226 = vsyncadd [#allocation3], 4294967168 }
   0xc   :  { %227 = dma.done.wait [#allocation6], 272  }
   0xd   :  { %228 = vsyncadd [#allocation6], 4294967024  ;;  %v73_v0 = vlaneseq  ;;  %v58_v2 = vld [vmem:[#allocation2] sm:$0xff]  ;;  %v59_v3 = vld [vmem:[#allocation7] sm:$0xff]  ;;  %vm63_vm0 = vcmask 261120   ;;  %v236_v10 = vmov 0  }
   0xe   :  { %v61_v4 = vmul.f32 %v59_v3, %v58_v2  ;;  %v128_v5 = vld [vmem:[#allocation5] ss:$0 sm:$0xff]  ;;  %v60_v6 = vld [vmem:[#allocation7 + $0x8] sm:$0xff]  ;;  %126 = vset.pattern.permute.xlu2 %v236_v10  ;;  %127 = vset.pattern.permute.xlu0 %v236_v10  ;;  %s237_s0 = smov [#allocation8]   ;;  %s106_s30 = sshll.u32 %s273_s3, 4  ;;  %vm94_vm1 = vcmask 1041409   ;;  %s107_s30 = int_to_ptr.hbm [resolvable:$true] %s106_s30 }
   0xf   :  { %v74_v1 = vshrl.u32 %v73_v0, 7  ;;  %v62_v8 = vmul.f32 %v60_v6, %v58_v2  ;;  %v91_v16 = vand.u32 127, %v73_v0  ;;  %s104_s2 = sshll.u32 %s237_s0, 4  ;;  %vm97_vm2 = vcmask 58368   ;;  %s105_s2 = int_to_ptr.vmem [resolvable:$true] %s104_s2 }
  0x10   :  { %v64_v7 = vsel %vm63_vm0, %v61_v4, 0.0 }
  0x11   :  { %124 = vset.pattern.permute.xlu1 %v74_v1  ;;  %65 = vadd.xlane.f32.xlu0 %v64_v7  ;;  %v67_v9 = vsel %vm63_vm0, %v62_v8, 0.0 }
  0x19   :  { %77 = vperm.xlu1 %124, %v128_v5   ;;  %68 = vadd.xlane.f32.xlu0 %v67_v9 }
  0x21   :  { %125 = vset.pattern.permute.xlu1 %v236_v10 }
  0x84   :  { %v66_v12 = vpop.xlane.xlu0 %65 }
  0x8b   :  { %v78_v11 = vpop.permute.xlu1 %77 }
  0x8c   :  { %v80_v13 = vadd.f32 %v78_v11, %v66_v12  ;;  %v69_v14 = vpop.xlane.xlu0 %68 }
  0x8d   :  { %v81_v15 = vadd.f32 %v78_v11, %v69_v14 }
  0x8e   :  { %85 = vperm.xlu1 %125, %v80_v13  }
  0x8f   :  { %88 = vperm.xlu2 %126, %v81_v15  }
  0xe9   :  { %v89_v17 = vpop.permute.xlu2 %88 }
  0xea   :  { %v93_v19 = vperm.slane %v89_v17, %v91_v16 }
 0x100   :  { %v86_v18 = vpop.permute.xlu1 %85 }
 0x101   :  { %v92_v20 = vperm.slane %v86_v18, %v91_v16 }
 0x103   :  { %v95_v21 = vsel %vm94_vm1, %v93_v19, %v92_v20 }
 0x104   :  { %98 = vst.msk [vmem:[#allocation8] sm:$0x3] %vm97_vm2, %v95_v21 }
 0x105   :  { %109 = dma.vmem_to_hbm [thread:$0]  %s105_s2, 32, %s107_s30, [#allocation4]  }
 0x106   :  { %229 = dma.done.wait [#allocation4], 32  }
 0x107   :  { %230 = vsyncadd [#allocation4], 4294967264 }
 0x108   :  { %114 = vsyncpa [#allocation3], 1 }
 0x109   :  { %115 = vsyncpa [#allocation6], 1 }
 0x10a   :  { %116 = vsyncpa [#allocation4], 1 }

// kernel: tpu_custom_call.1
= control target key start
LH: loop header
LB: loop body
LE: loop exit
PB: predicated region body
PF: predicated region fallthrough
CT: control target
= control target key end

     0   :  { %8 = vsyncpa [#allocation3], 0  ;;  %s270_s0 = inlined_call_operand.hbm [shape: f32[1,8,32], index: 0, kind: input, shape index: {}]   ;;  %s271_s1 = inlined_call_operand.hbm [shape: f32[1,8], index: 1, kind: input, shape index: {}]   ;;  %s272_s2 = inlined_call_operand.hbm [shape: f32[2,8,32], index: 2, kind: input, shape index: {}]   ;;  %s273_s3 = inlined_call_operand.hbm [shape: f32[2,8], index: 3, kind: output, shape index: {}]  }
   0x1   :  { %9 = vsyncpa [#allocation6], 0  ;;  %s27_s14 = sshll.u32 %s271_s1, 4  ;;  %s28_s14 = int_to_ptr.hbm [resolvable:$true] %s27_s14 }
   0x2   :  { %10 = vsyncpa [#allocation4], 0  ;;  %s231_s15 = smov [#allocation5]   ;;  %s16_s19 = sshll.u32 %s270_s0, 4  ;;  %s17_s19 = int_to_ptr.hbm [resolvable:$true] %s16_s19 }
   0x3   :  { %s29_s16 = sshll.u32 %s231_s15, 4  ;;  %s232_s20 = smov [#allocation2]   ;;  %s30_s16 = int_to_ptr.vmem [resolvable:$true] %s29_s16 }
   0x4   :  { %32 = dma.hbm_to_vmem [thread:$0]  %s28_s14, 16, %s30_s16, [#allocation6]  }
   0x5   :  { %s18_s21 = sshll.u32 %s232_s20, 4  ;;  %s37_s24 = sshll.u32 %s272_s2, 4  ;;  %s19_s21 = int_to_ptr.vmem [resolvable:$true] %s18_s21  ;;  %s38_s24 = int_to_ptr.hbm [resolvable:$true] %s37_s24 }
   0x6   :  { %21 = dma.hbm_to_vmem [thread:$0]  %s17_s19, 128, %s19_s21, [#allocation3]  }
   0x7   :  { %s233_s1 = smov [#allocation7]   ;;  %s234_s26 = smov 128  }
   0x8   :  { %s39_s25 = sshll.u32 %s233_s1, 4  ;;  %s235_s27 = smov 8   ;;  %s40_s25 = int_to_ptr.vmem [resolvable:$true] %s39_s25 }
   0x9   :  { %45 = dma.hbm_to_vmem [thread:$0]  %s38_s24, 256, %s40_s25, [#allocation6], %s234_s26, %s234_s26, %s235_s27  }
   0xa   :  { %225 = dma.done.wait [#allocation3], 128  }
   0xb   :  { %226 = vsyncadd [#allocation3], 4294967168 }
   0xc   :  { %227 = dma.done.wait [#allocation6], 272  }
   0xd   :  { %228 = vsyncadd [#allocation6], 4294967024  ;;  %v73_v0 = vlaneseq  ;;  %v58_v2 = vld [vmem:[#allocation2] sm:$0xff]  ;;  %v59_v3 = vld [vmem:[#allocation7] sm:$0xff]  ;;  %vm63_vm0 = vcmask 261120   ;;  %v236_v10 = vmov 0  }
   0xe   :  { %v61_v4 = vmul.f32 %v59_v3, %v58_v2  ;;  %v128_v5 = vld [vmem:[#allocation5] ss:$0 sm:$0xff]  ;;  %v60_v6 = vld [vmem:[#allocation7 + $0x8] sm:$0xff]  ;;  %126 = vset.pattern.permute.xlu2 %v236_v10  ;;  %127 = vset.pattern.permute.xlu0 %v236_v10  ;;  %s237_s0 = smov [#allocation8]   ;;  %s106_s30 = sshll.u32 %s273_s3, 4  ;;  %vm94_vm1 = vcmask 1041409   ;;  %s107_s30 = int_to_ptr.hbm [resolvable:$true] %s106_s30 }
   0xf   :  { %v74_v1 = vshrl.u32 %v73_v0, 7  ;;  %v62_v8 = vmul.f32 %v60_v6, %v58_v2  ;;  %v91_v16 = vand.u32 127, %v73_v0  ;;  %s104_s2 = sshll.u32 %s237_s0, 4  ;;  %vm97_vm2 = vcmask 58368   ;;  %s105_s2 = int_to_ptr.vmem [resolvable:$true] %s104_s2 }
  0x10   :  { %v64_v7 = vsel %vm63_vm0, %v61_v4, 0.0 }
  0x11   :  { %124 = vset.pattern.permute.xlu1 %v74_v1  ;;  %65 = vadd.xlane.f32.xlu0 %v64_v7  ;;  %v67_v9 = vsel %vm63_vm0, %v62_v8, 0.0 }
  0x19   :  { %77 = vperm.xlu1 %124, %v128_v5   ;;  %68 = vadd.xlane.f32.xlu0 %v67_v9 }
  0x21   :  { %125 = vset.pattern.permute.xlu1 %v236_v10 }
  0x84   :  { %v66_v12 = vpop.xlane.xlu0 %65 }
  0x8b   :  { %v78_v11 = vpop.permute.xlu1 %77 }
  0x8c   :  { %v80_v13 = vadd.f32 %v78_v11, %v66_v12  ;;  %v69_v14 = vpop.xlane.xlu0 %68 }
  0x8d   :  { %v81_v15 = vadd.f32 %v78_v11, %v69_v14 }
  0x8e   :  { %85 = vperm.xlu1 %125, %v80_v13  }
  0x8f   :  { %88 = vperm.xlu2 %126, %v81_v15  }
  0xe9   :  { %v89_v17 = vpop.permute.xlu2 %88 }
  0xea   :  { %v93_v19 = vperm.slane %v89_v17, %v91_v16 }
 0x100   :  { %v86_v18 = vpop.permute.xlu1 %85 }
 0x101   :  { %v92_v20 = vperm.slane %v86_v18, %v91_v16 }
 0x103   :  { %v95_v21 = vsel %vm94_vm1, %v93_v19, %v92_v20 }
 0x104   :  { %98 = vst.msk [vmem:[#allocation8] sm:$0x3] %vm97_vm2, %v95_v21 }
 0x105   :  { %109 = dma.vmem_to_hbm [thread:$0]  %s105_s2, 32, %s107_s30, [#allocation4]  }
 0x106   :  { %229 = dma.done.wait [#allocation4], 32  }
 0x107   :  { %230 = vsyncadd [#allocation4], 4294967264 }
 0x108   :  { %114 = vsyncpa [#allocation3], 1 }
 0x109   :  { %115 = vsyncpa [#allocation6], 1 }
 0x10a   :  { %116 = vsyncpa [#allocation4], 1 }

</bundles_post_ra>
